<compile_context>
chip_gen: v6e
topology: v6e:2x2x1
jax: 0.10.0
libtpu: 0.0.40
codegen_flags: <defaults>
</compile_context>

<pallas_src>
import jax
import jax.numpy as jnp
from jax.experimental import pallas as pl
from jax.experimental.pallas import tpu as pltpu


def dblock_kernel(x_ref, w12_ref, b12_ref, wmols_ref, bmols_ref, out_ref):
    w12 = w12_ref[...]                                   # [I, 2H] (f32 or bf16)
    x = x_ref[...].astype(w12.dtype)                     # no-op cast for f32

    # Fused gate matmul: one lane-dense [tb, 2H] result, f32 accumulation.
    h = jnp.dot(x, w12, preferred_element_type=jnp.float32) + b12_ref[...]

    # One full-width tanh over the whole [tb, 2H] tile; sigmoid recovered via
    # 0.5*tanh(z/2) + 0.5 (the 0.5 on z was folded into W2/b2 by fuse_params).
    H = w12_ref.shape[1] // 2
    g = jnp.tanh(h)
    t = g[:, :H] * (0.5 * g[:, H:] + 0.5)                # [tb, H], f32

    # Fused output matmul: one [tb, 2O] result = (mu || logsigma).
    wmols = wmols_ref[...]
    out = jnp.dot(t.astype(wmols.dtype), wmols,
                  preferred_element_type=jnp.float32) + bmols_ref[...]
    out_ref[...] = out.astype(out_ref.dtype)


def _round_up(n, m):
    return ((n + m - 1) // m) * m


def _batch_tile(B, block_b):
    """Pick the batch tile: as large as block_b, a multiple of 8 sublanes, and
    (for big-enough batches) at least 2 grid steps so the 'parallel' axis can
    shard across v7x's two TensorCores."""
    if B < 16:
        return B  # one block covering the whole batch (block == full dim is legal)
    return max(8, min(block_b, _round_up(pl.cdiv(B, 2), 8)))


def dblock_forward(x, params, *, block_b=1024, split=True):
    """x: [B, I] float32.

    params from fuse_params():
      w12     : [I, 2H]  (W1 || 0.5*W2), f32 or bf16
      b12     : [1, 2H]  (b1 || 0.5*b2), f32
      w_mu_ls : [H, 2O]  (Wmu || Wls),   f32 or bf16
      b_mu_ls : [1, 2O]  (bmu || bls),   f32

    Returns (mu, logsigma) each [B, O] if split=True, else the fused [B, 2O]
    slab (mu || logsigma) for consumers that prefer to slice under jit.
    """
    B, I = x.shape
    w12, b12 = params["w12"], params["b12"]
    wmols, bmols = params["w_mu_ls"], params["b_mu_ls"]
    H2, O2 = w12.shape[1], wmols.shape[1]
    H, O = H2 // 2, O2 // 2

    tb = _batch_tile(B, block_b)
    grid = (pl.cdiv(B, tb),)  # no host pad: Pallas masks the last partial block

    out = pl.pallas_call(
        dblock_kernel,
        out_shape=jax.ShapeDtypeStruct((B, O2), jnp.float32),
        grid=grid,
        in_specs=[
            pl.BlockSpec((tb, I), lambda i: (i, 0)),   # x: tiled/pipelined over batch
            pl.BlockSpec((I, H2), lambda i: (0, 0)),   # fused gate weights (VMEM resident)
            pl.BlockSpec((1, H2), lambda i: (0, 0)),   # fused gate biases  (VMEM resident)
            pl.BlockSpec((H, O2), lambda i: (0, 0)),   # fused out weights  (VMEM resident)
            pl.BlockSpec((1, O2), lambda i: (0, 0)),   # fused out biases   (VMEM resident)
        ],
        out_specs=pl.BlockSpec((tb, O2), lambda i: (i, 0)),
        compiler_params=pltpu.CompilerParams(
            dimension_semantics=("parallel",),
        ),
    )(x, w12, b12, wmols, bmols)

    if not split:
        return out
    return out[:, :O], out[:, O:]


def init_raw_params(key, input_size, hidden_size, output_size):
    """PyTorch-nn.Linear-like uniform fan-in init.  Weights stored as
    [in, out] (transpose of nn.Linear's [out, in]) for row-major matmuls."""
    ks = jax.random.split(key, 8)

    def lin(kw, kb, fan_in, fan_out):
        bound = 1.0 / (fan_in ** 0.5)
        w = jax.random.uniform(kw, (fan_in, fan_out), jnp.float32, -bound, bound)
        b = jax.random.uniform(kb, (1, fan_out), jnp.float32, -bound, bound)
        return w, b

    w1, b1 = lin(ks[0], ks[1], input_size, hidden_size)
    w2, b2 = lin(ks[2], ks[3], input_size, hidden_size)
    wmu, bmu = lin(ks[4], ks[5], hidden_size, output_size)
    wls, bls = lin(ks[6], ks[7], hidden_size, output_size)
    return {"w1": w1, "b1": b1, "w2": w2, "b2": b2,
            "w_mu": wmu, "b_mu": bmu, "w_ls": wls, "b_ls": bls}


def fuse_params(raw, dtype=jnp.float32):
    """One-time weight prep for the kernel: fuse along out-features, fold the
    0.5 of sigmoid(z) = 0.5*tanh(z/2) + 0.5 into the fc2 weights/bias, and
    optionally store the matmul weights in bf16 (biases stay f32)."""
    w12 = jnp.concatenate([raw["w1"], 0.5 * raw["w2"]], axis=1).astype(dtype)
    b12 = jnp.concatenate([raw["b1"], 0.5 * raw["b2"]], axis=1).astype(jnp.float32)
    wmols = jnp.concatenate([raw["w_mu"], raw["w_ls"]], axis=1).astype(dtype)
    bmols = jnp.concatenate([raw["b_mu"], raw["b_ls"]], axis=1).astype(jnp.float32)
    return {"w12": w12, "b12": b12, "w_mu_ls": wmols, "b_mu_ls": bmols}


def dblock_reference(x, raw):
    """Pure-JAX reference with the exact module semantics (unfused weights)."""
    t = jnp.tanh(x @ raw["w1"] + raw["b1"]) * jax.nn.sigmoid(x @ raw["w2"] + raw["b2"])
    return t @ raw["w_mu"] + raw["b_mu"], t @ raw["w_ls"] + raw["b_ls"]


if __name__ == "__main__":
    key = jax.random.PRNGKey(0)
    k_x, k_p = jax.random.split(key)

    # Batched so the parallel grid / weight residency actually kicks in:
    # B=256 -> 2 grid blocks of 128 rows; 2H = 128 lanes, 2O = 32 lanes.
    B, I, H, O = 256, 32, 64, 16
    x = jax.random.normal(k_x, (B, I), jnp.float32)
    raw = init_raw_params(k_p, I, H, O)
    mu_ref, ls_ref = dblock_reference(x, raw)

    # --- f32 path: tight check against the reference -------------------------
    params_f32 = fuse_params(raw, dtype=jnp.float32)
    mu, logsigma = dblock_forward(x, params_f32)
    jax.block_until_ready((mu, logsigma))
    assert mu.shape == (B, O) and logsigma.shape == (B, O)
    assert jnp.allclose(mu, mu_ref, atol=1e-4, rtol=1e-4)
    assert jnp.allclose(logsigma, ls_ref, atol=1e-4, rtol=1e-4)

    # --- bf16-operand path (f32 accumulation): tolerance relaxed on purpose --
    params_bf16 = fuse_params(raw, dtype=jnp.bfloat16)
    mu_b, ls_b = dblock_forward(x, params_bf16)
    jax.block_until_ready((mu_b, ls_b))
    assert jnp.allclose(mu_b, mu_ref, atol=5e-2, rtol=5e-2)
    assert jnp.allclose(ls_b, ls_ref, atol=5e-2, rtol=5e-2)

    print("KERNEL_OK")
</pallas_src>

<mosaic_0001>
module attributes {stable_mosaic.version = 11 : i64} {
  func.func @dblock_kernel(%arg0: i32, %arg1: memref<128x32xf32, #tpu.memory_space<vmem>>, %arg2: memref<32x128xf32, #tpu.memory_space<vmem>>, %arg3: memref<1x128xf32, #tpu.memory_space<vmem>>, %arg4: memref<64x32xf32, #tpu.memory_space<vmem>>, %arg5: memref<1x32xf32, #tpu.memory_space<vmem>>, %arg6: memref<128x32xf32, #tpu.memory_space<vmem>>) attributes {dimension_semantics = [#tpu.dimension_semantics<parallel>], iteration_bounds = array<i64: 2>, scalar_prefetch = 0 : i64, scratch_operands = 0 : i64, tpu.core_type = #tpu.core_type<tc>, window_params = [{transform_indices = @transform_0, window_bounds = array<i64: 128, 32>}, {pipeline_mode = #tpu.pipeline_mode<synchronous>, transform_indices = @transform_1, window_bounds = array<i64: 32, 128>}, {pipeline_mode = #tpu.pipeline_mode<synchronous>, transform_indices = @transform_2, window_bounds = array<i64: 1, 128>}, {pipeline_mode = #tpu.pipeline_mode<synchronous>, transform_indices = @transform_3, window_bounds = array<i64: 64, 32>}, {pipeline_mode = #tpu.pipeline_mode<synchronous>, transform_indices = @transform_4, window_bounds = array<i64: 1, 32>}, {transform_indices = @transform_5, window_bounds = array<i64: 128, 32>}]} {
    %c0 = arith.constant 0 : index
    %c0_0 = arith.constant 0 : index
    %0 = vector.load %arg2[%c0, %c0_0] : memref<32x128xf32, #tpu.memory_space<vmem>>, vector<32x128xf32>
    %c0_1 = arith.constant 0 : index
    %c0_2 = arith.constant 0 : index
    %1 = vector.load %arg1[%c0_1, %c0_2] : memref<128x32xf32, #tpu.memory_space<vmem>>, vector<128x32xf32>
    %cst = arith.constant dense<0.000000e+00> : vector<128x128xf32>
    %2 = tpu.matmul %1, %0, %cst {dimension_numbers = #tpu.dot_dimension_numbers<[1], [0], [0], [1], [0, 0, 1, 1], [], []>} : vector<128x32xf32>, vector<32x128xf32>, vector<128x128xf32> -> vector<128x128xf32>
    %c0_3 = arith.constant 0 : index
    %c0_4 = arith.constant 0 : index
    %3 = vector.load %arg3[%c0_3, %c0_4] : memref<1x128xf32, #tpu.memory_space<vmem>>, vector<1x128xf32>
    %4 = vector.broadcast %3 : vector<1x128xf32> to vector<128x128xf32>
    %5 = arith.addf %2, %4 : vector<128x128xf32>
    %6 = math.tanh %5 : vector<128x128xf32>
    %7 = vector.extract_strided_slice %6 {offsets = [0, 0], sizes = [128, 64], strides = [1, 1]} : vector<128x128xf32> to vector<128x64xf32>
    %8 = vector.extract_strided_slice %6 {offsets = [0, 64], sizes = [128, 64], strides = [1, 1]} : vector<128x128xf32> to vector<128x64xf32>
    %cst_5 = arith.constant 5.000000e-01 : f32
    %9 = vector.broadcast %cst_5 : f32 to vector<128x64xf32>
    %10 = arith.mulf %9, %8 : vector<128x64xf32>
    %cst_6 = arith.constant 5.000000e-01 : f32
    %11 = vector.broadcast %cst_6 : f32 to vector<128x64xf32>
    %12 = arith.addf %10, %11 : vector<128x64xf32>
    %13 = arith.mulf %7, %12 : vector<128x64xf32>
    %c0_7 = arith.constant 0 : index
    %c0_8 = arith.constant 0 : index
    %14 = vector.load %arg4[%c0_7, %c0_8] : memref<64x32xf32, #tpu.memory_space<vmem>>, vector<64x32xf32>
    %cst_9 = arith.constant dense<0.000000e+00> : vector<128x32xf32>
    %15 = tpu.matmul %13, %14, %cst_9 {dimension_numbers = #tpu.dot_dimension_numbers<[1], [0], [0], [1], [0, 0, 1, 1], [], []>} : vector<128x64xf32>, vector<64x32xf32>, vector<128x32xf32> -> vector<128x32xf32>
    %c0_10 = arith.constant 0 : index
    %c0_11 = arith.constant 0 : index
    %16 = vector.load %arg5[%c0_10, %c0_11] : memref<1x32xf32, #tpu.memory_space<vmem>>, vector<1x32xf32>
    %17 = vector.broadcast %16 : vector<1x32xf32> to vector<128x32xf32>
    %18 = arith.addf %15, %17 : vector<128x32xf32>
    %c0_12 = arith.constant 0 : index
    %c0_13 = arith.constant 0 : index
    %19 = vector.load %arg6[%c0_12, %c0_13] : memref<128x32xf32, #tpu.memory_space<vmem>>, vector<128x32xf32>
    tpu.vector_store %arg6[%c0_12, %c0_13], %18 {strides = array<i32>} : memref<128x32xf32, #tpu.memory_space<vmem>>, vector<128x32xf32>,
    return
  }
  func.func @transform_0(%arg0: i32) -> (i32, i32) {
    %c0_i32 = arith.constant 0 : i32
    %c0_i32_0 = arith.constant 0 : i32
    return %arg0, %c0_i32 : i32, i32
  }
  func.func @transform_1(%arg0: i32) -> (i32, i32) {
    %c0_i32 = arith.constant 0 : i32
    %c0_i32_0 = arith.constant 0 : i32
    %c0_i32_1 = arith.constant 0 : i32
    return %c0_i32, %c0_i32_0 : i32, i32
  }
  func.func @transform_2(%arg0: i32) -> (i32, i32) {
    %c0_i32 = arith.constant 0 : i32
    %c0_i32_0 = arith.constant 0 : i32
    %c0_i32_1 = arith.constant 0 : i32
    return %c0_i32, %c0_i32_0 : i32, i32
  }
  func.func @transform_3(%arg0: i32) -> (i32, i32) {
    %c0_i32 = arith.constant 0 : i32
    %c0_i32_0 = arith.constant 0 : i32
    %c0_i32_1 = arith.constant 0 : i32
    return %c0_i32, %c0_i32_0 : i32, i32
  }
  func.func @transform_4(%arg0: i32) -> (i32, i32) {
    %c0_i32 = arith.constant 0 : i32
    %c0_i32_0 = arith.constant 0 : i32
    %c0_i32_1 = arith.constant 0 : i32
    return %c0_i32, %c0_i32_0 : i32, i32
  }
  func.func @transform_5(%arg0: i32) -> (i32, i32) {
    %c0_i32 = arith.constant 0 : i32
    %c0_i32_0 = arith.constant 0 : i32
    return %arg0, %c0_i32 : i32, i32
  }
}

</mosaic_0001>

<bundles_post_ra>
// kernel: tpu_custom_call.1
= control target key start
LH: loop header
LB: loop body
LE: loop exit
PB: predicated region body
PF: predicated region fallthrough
CT: control target
= control target key end

     0   :  { %s1115_s18 = smov 0   ;;  %s1346_s0 = inlined_call_operand.vmem [shape: f32[256,32], index: 0, kind: input, shape index: {}]   ;;  %s1347_s1 = inlined_call_operand.vmem [shape: f32[32,128], index: 1, kind: input, shape index: {}]   ;;  %s1348_s2 = inlined_call_operand.vmem [shape: f32[1,128], index: 2, kind: input, shape index: {}]   ;;  %s1349_s3 = inlined_call_operand.vmem [shape: f32[64,32], index: 3, kind: input, shape index: {}]   ;;  %s1350_s4 = inlined_call_operand.vmem [shape: f32[1,32], index: 4, kind: input, shape index: {}]   ;;  %s1351_s5 = inlined_call_operand.vmem [shape: f32[256,32], index: 5, kind: output, shape index: {}]  }
   0x1 LB: > { %s858_s19 = sadd.s32 4294967295, %s1082_s18   ;;  %p862_p0 = scmp.ge.s32.totalorder %s1082_s18, 1  ;;  %s1082_s18 = sphi %s1115_s18, %s15_s18  }
   0x2   : > { %p188_p1 = scmp.lt.s32.totalorder %s1082_s18, 3 }
   0x4   : > { %p189_p2 = pnand %p862_p0, %p188_p1 }
   0x5   : > { %s863_s24 = sshll.u32 (!%p189_p2), %s858_s19, 4  ;;  %s1084_s28 = smov (!%p189_p2), 64  }
   0x6   : > { %192 = sbr.rel (%p189_p2) target bundleno = 584 (0x248), region = 40  ;;  %p217_p3 = scmp.lt.s32.totalorder (!%p189_p2), %s863_s24, 31 }
   0xb   : > { %v231_v0 = vld [vmem:[%s1347_s1 + $0x18] sm:$0xff]  ;;  %v230_v1 = vld [vmem:[%s1347_s1 + $0x10] sm:$0xff]  ;;  %v229_v2 = vld [vmem:[%s1347_s1 + $0x8] sm:$0xff]  ;;  %s1353_s24 = smov (!%p217_p3, %s863_s24), 31  ;;  %vm255_vm0 = vcmask 261120   ;;  %vm592_vm1 = vcmask 523264  }
   0xc   : > { %947 = vmatprep.subr.mxu0 %v231_v0  ;;  %v228_v3 = vld [vmem:[%s1347_s1] sm:$0xff]  ;;  %s864_s29 = sshll.u32 %s1353_s24, 3  ;;  %v584_v20 = vld [vmem:[%s1349_s3 + $0x38] sm:$0xff]  ;;  %v583_v21 = vld [vmem:[%s1349_s3 + $0x30] sm:$0xff] }
   0xd   : > { %948 = vmatpush3.msra.mxu0 %v231_v0  ;;  %s1143_s7 = scalar_lea.vmem %s1346_s0, %s864_s29  ;;  %1019 = vmatprep.subr.mxu1 %v584_v20  ;;  %v582_v22 = vld [vmem:[%s1349_s3 + $0x28] sm:$0xff]  ;;  %v581_v23 = vld [vmem:[%s1349_s3 + $0x20] sm:$0xff]  ;;  %v580_v24 = vld [vmem:[%s1349_s3 + $0x18] sm:$0xff]  ;;  %s1309_s9 = scalar_lea.vmem %s1351_s5, %s864_s29 }
   0xe   : > { %949 = vmatprep.subr.mxu0 %v230_v1  ;;  %v232_v4 = vld [vmem:[%s1143_s7] sm:$0xff]  ;;  %v233_v5 = vld [vmem:[%s1143_s7 + $0x8] sm:$0xff]  ;;  %v234_v6 = vld [vmem:[%s1143_s7 + $0x10] sm:$0xff]  ;;  %1027 = vmatpush3.msra.mxu1 %v584_v20 }
   0xf   : > { %950 = vmatpush3.msra.mxu0 %v230_v1  ;;  %955 = vmatprep.mubr.msk.f32.mxu0 %vm255_vm0, %v232_v4  ;;  %v235_v7 = vld [vmem:[%s1143_s7 + $0x18] sm:$0xff]  ;;  %v236_v8 = vld [vmem:[%s1143_s7 + $0x20] sm:$0xff]  ;;  %v237_v9 = vld [vmem:[%s1143_s7 + $0x28] sm:$0xff] }
  0x10   : > { %951 = vmatprep.subr.mxu0 %v229_v2  ;;  %v238_v10 = vld [vmem:[%s1143_s7 + $0x30] sm:$0xff]  ;;  %v239_v11 = vld [vmem:[%s1143_s7 + $0x38] sm:$0xff]  ;;  %v240_v12 = vld [vmem:[%s1143_s7 + $0x40] sm:$0xff]  ;;  %1020 = vmatprep.subr.mxu1 %v583_v21 }
  0x11   : > { %952 = vmatpush3.msra.mxu0 %v229_v2  ;;  %v241_v13 = vld [vmem:[%s1143_s7 + $0x48] sm:$0xff]  ;;  %v242_v14 = vld [vmem:[%s1143_s7 + $0x50] sm:$0xff]  ;;  %v243_v15 = vld [vmem:[%s1143_s7 + $0x58] sm:$0xff]  ;;  %1028 = vmatpush3.msra.mxu1 %v583_v21 }
  0x12   : > { %953 = vmatprep.subr.mxu0 %v228_v3  ;;  %v244_v16 = vld [vmem:[%s1143_s7 + $0x60] sm:$0xff]  ;;  %v245_v17 = vld [vmem:[%s1143_s7 + $0x68] sm:$0xff]  ;;  %v246_v18 = vld [vmem:[%s1143_s7 + $0x70] sm:$0xff]  ;;  %1021 = vmatprep.subr.mxu1 %v582_v22 }
  0x13   : > { %954 = vmatpush3.msra.mxu0 %v228_v3  ;;  %v247_v19 = vld [vmem:[%s1143_s7 + $0x78] sm:$0xff]  ;;  %1029 = vmatpush3.msra.mxu1 %v582_v22  ;;  %v1197_v27 = vld [vmem:[%s1348_s2] ss:$0 sm:$0xff]  ;;  %v579_v38 = vld [vmem:[%s1349_s3 + $0x10] sm:$0xff] }
  0x14   : > { %956 = vmatmul.mubr.msk.f32.vlgmr.msra.gmra.mxu0 %vm255_vm0, %v233_v5  ;;  %979 = vmatprep.subr.mxu0 %v584_v20  ;;  %v578_v41 = vld [vmem:[%s1349_s3 + $0x8] sm:$0xff]  ;;  %v577_v44 = vld [vmem:[%s1349_s3] sm:$0xff] }
  0x15   : > { %958 = vmatprep.mubr.msk.f32.mxu0 %vm255_vm0, %v234_v6  ;;  %980 = vmatpush3.msra.mxu0 %v584_v20 }
  0x16   : > { %981 = vmatprep.subr.mxu0 %v583_v21  ;;  %1022 = vmatprep.subr.mxu1 %v581_v23 }
  0x17   : > { %982 = vmatpush3.msra.mxu0 %v583_v21  ;;  %1030 = vmatpush3.msra.mxu1 %v581_v23 }
  0x18   : > { %959 = vmatmul.mubr.msk.f32.gmra.mxu0 %vm255_vm0, %v235_v7  ;;  %983 = vmatprep.subr.mxu0 %v582_v22 }
  0x19   : > { %961 = vmatprep.mubr.msk.f32.mxu0 %vm255_vm0, %v236_v8  ;;  %984 = vmatpush3.msra.mxu0 %v582_v22 }
  0x1a   : > { %985 = vmatprep.subr.mxu0 %v581_v23  ;;  %1023 = vmatprep.subr.mxu1 %v580_v24 }
  0x1b   : > { %986 = vmatpush3.msra.mxu0 %v581_v23  ;;  %1031 = vmatpush3.msra.mxu1 %v580_v24 }
  0x1c   : > { %962 = vmatmul.mubr.msk.f32.gmra.mxu0 %vm255_vm0, %v237_v9  ;;  %987 = vmatprep.subr.mxu0 %v580_v24 }
  0x1d   : > { %964 = vmatprep.mubr.msk.f32.mxu0 %vm255_vm0, %v238_v10  ;;  %988 = vmatpush3.msra.mxu0 %v580_v24 }
  0x1e   : > { %1024 = vmatprep.subr.mxu1 %v579_v38  ;;  %989 = vmatprep.subr.mxu0 %v579_v38 }
  0x1f   : > { %1032 = vmatpush3.msra.mxu1 %v579_v38  ;;  %990 = vmatpush3.msra.mxu0 %v579_v38 }
  0x20   : > { %965 = vmatmul.mubr.msk.f32.gmra.mxu0 %vm255_vm0, %v239_v11  ;;  %1025 = vmatprep.subr.mxu1 %v578_v41 }
  0x21   : > { %967 = vmatprep.mubr.msk.f32.mxu0 %vm255_vm0, %v240_v12  ;;  %991 = vmatprep.subr.mxu0 %v578_v41 }
  0x22   : > { %1033 = vmatpush3.msra.mxu1 %v578_v41  ;;  %992 = vmatpush3.msra.mxu0 %v578_v41 }
  0x23   : > { %1026 = vmatprep.subr.mxu1 %v577_v44  ;;  %993 = vmatprep.subr.mxu0 %v577_v44 }
  0x24   : > { %968 = vmatmul.mubr.msk.f32.gmra.mxu0 %vm255_vm0, %v241_v13  ;;  %1034 = vmatpush3.msra.mxu1 %v577_v44 }
  0x25   : > { %970 = vmatprep.mubr.msk.f32.mxu0 %vm255_vm0, %v242_v14  ;;  %994 = vmatpush3.msra.mxu0 %v577_v44 }
  0x28   : > { %971 = vmatmul.mubr.msk.f32.gmra.mxu0 %vm255_vm0, %v243_v15 }
  0x29   : > { %973 = vmatprep.mubr.msk.f32.mxu0 %vm255_vm0, %v244_v16 }
  0x2c   : > { %974 = vmatmul.mubr.msk.f32.gmra.mxu0 %vm255_vm0, %v245_v17 }
  0x2d   : > { %976 = vmatprep.mubr.msk.f32.mxu0 %vm255_vm0, %v246_v18 }
  0x30   : > { %977 = vmatmul.mubr.msk.f32.gmra.mxu0 %vm255_vm0, %v247_v19 }
  0xd4   : > { %v1192_v25 = vpop.f32.mrf.mxu0 }
  0xd5   : > { %v376_v3 = vadd.f32 %v1192_v25, %v1197_v27 }
  0xd6   : > { %v370_v26 = vpop.f32.mrf.mxu0 }
  0xd7   : > { %v371_v55 = vadd.f32 %v1197_v27, %v370_v26 }
  0xd8   : > { %v960_v28 = vpop.f32.mrf.mxu0 }
  0xd9   : > { %v386_v29 = vadd.f32 %v960_v28, %v1197_v27 }
  0xda   : > { %v380_v30 = vpop.f32.mrf.mxu0 }
  0xdb   : > { %v381_v31 = vadd.f32 %v1197_v27, %v380_v30  ;;  %1044 = vtanh.f32 %v386_v29 }
  0xdc   : > { %v963_v32 = vpop.f32.mrf.mxu0 }
  0xdd   : > { %1046 = vtanh.f32 %v381_v31  ;;  %v396_v33 = vadd.f32 %v963_v32, %v1197_v27 }
  0xde   : > { %v390_v34 = vpop.f32.mrf.mxu0 }
  0xdf   : > { %1048 = vtanh.f32 %v396_v33  ;;  %v391_v35 = vadd.f32 %v1197_v27, %v390_v34 }
  0xe0   : > { %v966_v36 = vpop.f32.mrf.mxu0 }
  0xe1   : > { %1050 = vtanh.f32 %v391_v35  ;;  %v406_v37 = vadd.f32 %v966_v36, %v1197_v27 }
  0xe2   : > { %v400_v39 = vpop.f32.mrf.mxu0 }
  0xe3   : > { %1052 = vtanh.f32 %v406_v37  ;;  %v401_v40 = vadd.f32 %v1197_v27, %v400_v39 }
  0xe4   : > { %v969_v42 = vpop.f32.mrf.mxu0 }
  0xe5   : > { %1054 = vtanh.f32 %v401_v40  ;;  %v416_v43 = vadd.f32 %v969_v42, %v1197_v27 }
  0xe6   : > { %v410_v45 = vpop.f32.mrf.mxu0 }
  0xe7   : > { %1056 = vtanh.f32 %v416_v43  ;;  %v411_v46 = vadd.f32 %v1197_v27, %v410_v45 }
  0xe8   : > { %v972_v47 = vpop.f32.mrf.mxu0  ;;  %v1216_v48 = vpop.eup %1044 }
  0xe9   : > { %1058 = vtanh.f32 %v411_v46  ;;  %v426_v49 = vadd.f32 %v972_v47, %v1197_v27  ;;  %v468_v57 = vmul.f32 0.5, %v1216_v48 }
  0xea   : > { %v1219_v50 = vpop.eup %1046  ;;  %v420_v51 = vpop.f32.mrf.mxu0 }
  0xeb   : > { %1060 = vtanh.f32 %v426_v49  ;;  %v421_v52 = vadd.f32 %v1197_v27, %v420_v51  ;;  %v467_v53 = vmul.f32 0.5, %v1219_v50  ;;  %v484_v5 = vadd.f32 0.5, %v468_v57 }
  0xec   : > { %v1223_v54 = vpop.eup %1048  ;;  %v975_v56 = vpop.f32.mrf.mxu0 }
  0xed   : > { %1062 = vtanh.f32 %v421_v52  ;;  %v436_v58 = vadd.f32 %v975_v56, %v1197_v27  ;;  %v483_v59 = vadd.f32 0.5, %v467_v53  ;;  %v470_v60 = vmul.f32 0.5, %v1223_v54 }
  0xee   : > { %v1229_v61 = vpop.eup %1050  ;;  %v430_v62 = vpop.f32.mrf.mxu0 }
  0xef   : > { %1064 = vtanh.f32 %v436_v58  ;;  %v431_v63 = vadd.f32 %v1197_v27, %v430_v62  ;;  %517 = vrot.lane.b32.xlu0 %v483_v59, %s1084_s28  ;;  %v486_v0 = vadd.f32 0.5, %v470_v60  ;;  %v469_v1 = vmul.f32 0.5, %v1229_v61 }
  0xf0   : > { %v1234_v2 = vpop.eup %1052  ;;  %1066 = vtanh.f32 %v371_v55  ;;  %v978_v4 = vpop.f32.mrf.mxu0 }
  0xf1   : > { %1068 = vtanh.f32 %v431_v63  ;;  %523 = vrot.lane.b32.xlu1 %v486_v0, %s1084_s28  ;;  %v446_v7 = vadd.f32 %v978_v4, %v1197_v27  ;;  %v485_v10 = vadd.f32 0.5, %v469_v1  ;;  %v472_v12 = vmul.f32 0.5, %v1234_v2 }
  0xf2   : > { %v1239_v6 = vpop.eup %1054  ;;  %v440_v8 = vpop.f32.mrf.mxu0  ;;  %1070 = vtanh.f32 %v376_v3 }
  0xf3   : > { %v441_v9 = vadd.f32 %v1197_v27, %v440_v8  ;;  %519 = vrot.lane.b32.xlu0 %v484_v5, %s1084_s28  ;;  %v471_v11 = vmul.f32 0.5, %v1239_v6  ;;  %v488_v16 = vadd.f32 0.5, %v472_v12 }
  0xf4   : > { %v1246_v13 = vpop.eup %1056 }
  0xf5   : > { %1072 = vtanh.f32 %v441_v9  ;;  %521 = vrot.lane.b32.xlu1 %v485_v10, %s1084_s28  ;;  %v487_v14 = vadd.f32 0.5, %v471_v11  ;;  %v474_v18 = vmul.f32 0.5, %v1246_v13 }
  0xf6   : > { %v1059_v15 = vpop.eup %1058  ;;  %1074 = vtanh.f32 %v446_v7 }
  0xf7   : > { %525 = vrot.lane.b32.xlu0 %v487_v14, %s1084_s28  ;;  %v473_v17 = vmul.f32 0.5, %v1059_v15  ;;  %v490_v22 = vadd.f32 0.5, %v474_v18 }
  0xf8   : > { %v1251_v19 = vpop.eup %1060 }
  0xf9   : > { %527 = vrot.lane.b32.xlu1 %v488_v16, %s1084_s28  ;;  %v489_v20 = vadd.f32 0.5, %v473_v17  ;;  %v476_v24 = vmul.f32 0.5, %v1251_v19 }
  0xfa   : > { %v1063_v21 = vpop.eup %1062 }
  0xfb   : > { %529 = vrot.lane.b32.xlu0 %v489_v20, %s1084_s28  ;;  %v475_v23 = vmul.f32 0.5, %v1063_v21  ;;  %v492_v29 = vadd.f32 0.5, %v476_v24 }
  0xfc   : > { %v1256_v25 = vpop.eup %1064 }
  0xfd   : > { %v1258_v26 = vpop.eup %1066  ;;  %531 = vrot.lane.b32.xlu1 %v490_v22, %s1084_s28  ;;  %v491_v27 = vadd.f32 0.5, %v475_v23  ;;  %v478_v31 = vmul.f32 0.5, %v1256_v25 }
  0xfe   : > { %v1069_v28 = vpop.eup %1068  ;;  %v465_v34 = vmul.f32 0.5, %v1258_v26 }
  0xff   : > { %533 = vrot.lane.b32.xlu0 %v491_v27, %s1084_s28  ;;  %v477_v30 = vmul.f32 0.5, %v1069_v28  ;;  %v1263_v32 = vpop.eup %1070  ;;  %v494_v36 = vadd.f32 0.5, %v478_v31 }
 0x100   : > { %v481_v39 = vadd.f32 0.5, %v465_v34  ;;  %v466_v40 = vmul.f32 0.5, %v1263_v32 }
 0x101   : > { %535 = vrot.lane.b32.xlu1 %v492_v29, %s1084_s28  ;;  %v493_v33 = vadd.f32 0.5, %v477_v30 }
 0x102   : > { %v1073_v35 = vpop.eup %1072  ;;  %v482_v43 = vadd.f32 0.5, %v466_v40 }
 0x103   : > { %537 = vrot.lane.b32.xlu0 %v493_v33, %s1084_s28  ;;  %v479_v37 = vmul.f32 0.5, %v1073_v35  ;;  %v1075_v38 = vpop.eup %1074 }
 0x104   : > { %v480_v42 = vmul.f32 0.5, %v1075_v38 }
 0x105   : > { %539 = vrot.lane.b32.xlu1 %v494_v36, %s1084_s28  ;;  %v495_v41 = vadd.f32 0.5, %v479_v37 }
 0x106   : > { %v496_v44 = vadd.f32 0.5, %v480_v42 }
 0x107   : > { %513 = vrot.lane.b32.xlu0 %v481_v39, %s1084_s28 }
 0x109   : > { %541 = vrot.lane.b32.xlu1 %v495_v41, %s1084_s28 }
 0x10b   : > { %515 = vrot.lane.b32.xlu0 %v482_v43, %s1084_s28 }
 0x10d   : > { %543 = vrot.lane.b32.xlu1 %v496_v44, %s1084_s28 }
 0x161   : > { %v518_v45 = vpop.permute.xlu0 %517 }
 0x162   : > { %v563_v46 = vmul.f32 %v1219_v50, %v518_v45 }
 0x163   : > { %v524_v47 = vpop.permute.xlu1 %523 }
 0x164   : > { %998 = vmatprep.mubr.msk.f32.mxu1 %vm592_vm1, %v563_v46  ;;  %v566_v56 = vmul.f32 %v1223_v54, %v524_v47 }
 0x165   : > { %v520_v49 = vpop.permute.xlu0 %519 }
 0x166   : > { %v564_v51 = vmul.f32 %v1216_v48, %v520_v49 }
 0x167   : > { %v522_v52 = vpop.permute.xlu1 %521 }
 0x168   : > { %v565_v53 = vmul.f32 %v1229_v61, %v522_v52  ;;  %999 = vmatmul.mubr.msk.f32.vlgmr.msra.gmra.mxu1 %vm592_vm1, %v564_v51 }
 0x169   : > { %v526_v55 = vpop.permute.xlu0 %525 }
 0x16a   : > { %v567_v57 = vmul.f32 %v1239_v6, %v526_v55  ;;  %1001 = vmatprep.mubr.msk.f32.mxu1 %vm592_vm1, %v565_v53 }
 0x16b   : > { %v528_v58 = vpop.permute.xlu1 %527 }
 0x16c   : > { %1002 = vmatmul.mubr.msk.f32.gmra.mxu1 %vm592_vm1, %v566_v56  ;;  %v568_v48 = vmul.f32 %v1234_v2, %v528_v58 }
 0x16d   : > { %1004 = vmatprep.mubr.msk.f32.mxu1 %vm592_vm1, %v567_v57  ;;  %v530_v50 = vpop.permute.xlu0 %529 }
 0x16e   : > { %v569_v59 = vmul.f32 %v1059_v15, %v530_v50 }
 0x16f   : > { %v532_v60 = vpop.permute.xlu1 %531 }
 0x170   : > { %1005 = vmatmul.mubr.msk.f32.gmra.mxu1 %vm592_vm1, %v568_v48  ;;  %v570_v54 = vmul.f32 %v1246_v13, %v532_v60  ;;  %v884_v13 = vld [vmem:[%s1350_s4] ss:$0 sm:$0xff] }
 0x171   : > { %1007 = vmatprep.mubr.msk.f32.mxu1 %vm592_vm1, %v569_v59  ;;  %v534_v61 = vpop.permute.xlu0 %533 }
 0x172   : > { %v571_v62 = vmul.f32 %v1063_v21, %v534_v61 }
 0x173   : > { %v536_v63 = vpop.permute.xlu1 %535 }
 0x174   : > { %1008 = vmatmul.mubr.msk.f32.gmra.mxu1 %vm592_vm1, %v570_v54  ;;  %v572_v1 = vmul.f32 %v1251_v19, %v536_v63 }
 0x175   : > { %1010 = vmatprep.mubr.msk.f32.mxu1 %vm592_vm1, %v571_v62  ;;  %v538_v0 = vpop.permute.xlu0 %537 }
 0x176   : > { %v573_v3 = vmul.f32 %v1069_v28, %v538_v0 }
 0x177   : > { %v540_v2 = vpop.permute.xlu1 %539 }
 0x178   : > { %1011 = vmatmul.mubr.msk.f32.gmra.mxu1 %vm592_vm1, %v572_v1  ;;  %v574_v5 = vmul.f32 %v1256_v25, %v540_v2 }
 0x179   : > { %1013 = vmatprep.mubr.msk.f32.mxu1 %vm592_vm1, %v573_v3  ;;  %v514_v4 = vpop.permute.xlu0 %513 }
 0x17a   : > { %v561_v6 = vmul.f32 %v1258_v26, %v514_v4 }
 0x17b   : > { %v542_v7 = vpop.permute.xlu1 %541 }
 0x17c   : > { %v575_v8 = vmul.f32 %v1073_v35, %v542_v7  ;;  %995 = vmatprep.mubr.msk.f32.mxu0 %vm592_vm1, %v561_v6  ;;  %1014 = vmatmul.mubr.msk.f32.gmra.mxu1 %vm592_vm1, %v574_v5 }
 0x17d   : > { %v516_v9 = vpop.permute.xlu0 %515 }
 0x17e   : > { %v562_v10 = vmul.f32 %v1263_v32, %v516_v9  ;;  %1016 = vmatprep.mubr.msk.f32.mxu1 %vm592_vm1, %v575_v8 }
 0x17f   : > { %v544_v11 = vpop.permute.xlu1 %543 }
 0x180   : > { %v576_v12 = vmul.f32 %v1075_v38, %v544_v11  ;;  %996 = vmatmul.mubr.msk.f32.vlgmr.msra.gmra.mxu0 %vm592_vm1, %v562_v10 }
 0x182   : > { %1017 = vmatmul.mubr.msk.f32.gmra.mxu1 %vm592_vm1, %v576_v12 }
 0x228   : > { %v1000_v14 = vpop.f32.mrf.mxu1 }
 0x229   : > { %v723_v15 = vadd.f32 %v1000_v14, %v884_v13 }
 0x22a   : > { %v717_v16 = vpop.f32.mrf.mxu1 }
 0x22b   : > { %789 = vst.msk [vmem:[%s1309_s9 + $0x18] sm:$0xff] %vm255_vm0, %v723_v15  ;;  %v718_v17 = vadd.f32 %v884_v13, %v717_v16 }
 0x22c   : > { %v1003_v18 = vpop.f32.mrf.mxu1 }
 0x22d   : > { %788 = vst.msk [vmem:[%s1309_s9 + $0x10] sm:$0xff] %vm255_vm0, %v718_v17  ;;  %v733_v19 = vadd.f32 %v1003_v18, %v884_v13 }
 0x22e   : > { %v727_v20 = vpop.f32.mrf.mxu1 }
 0x22f   : > { %791 = vst.msk [vmem:[%s1309_s9 + $0x28] sm:$0xff] %vm255_vm0, %v733_v19  ;;  %v728_v21 = vadd.f32 %v884_v13, %v727_v20 }
 0x230   : > { %v1006_v22 = vpop.f32.mrf.mxu1 }
 0x231   : > { %790 = vst.msk [vmem:[%s1309_s9 + $0x20] sm:$0xff] %vm255_vm0, %v728_v21  ;;  %v743_v23 = vadd.f32 %v1006_v22, %v884_v13 }
 0x232   : > { %v737_v24 = vpop.f32.mrf.mxu1 }
 0x233   : > { %793 = vst.msk [vmem:[%s1309_s9 + $0x38] sm:$0xff] %vm255_vm0, %v743_v23  ;;  %v738_v25 = vadd.f32 %v884_v13, %v737_v24 }
 0x234   : > { %v1009_v26 = vpop.f32.mrf.mxu1 }
 0x235   : > { %792 = vst.msk [vmem:[%s1309_s9 + $0x30] sm:$0xff] %vm255_vm0, %v738_v25  ;;  %v753_v27 = vadd.f32 %v1009_v26, %v884_v13 }
 0x236   : > { %v747_v28 = vpop.f32.mrf.mxu1 }
 0x237   : > { %795 = vst.msk [vmem:[%s1309_s9 + $0x48] sm:$0xff] %vm255_vm0, %v753_v27  ;;  %v748_v29 = vadd.f32 %v884_v13, %v747_v28 }
 0x238   : > { %v1012_v30 = vpop.f32.mrf.mxu1 }
 0x239   : > { %794 = vst.msk [vmem:[%s1309_s9 + $0x40] sm:$0xff] %vm255_vm0, %v748_v29  ;;  %v763_v31 = vadd.f32 %v1012_v30, %v884_v13 }
 0x23a   : > { %v757_v32 = vpop.f32.mrf.mxu1 }
 0x23b   : > { %797 = vst.msk [vmem:[%s1309_s9 + $0x58] sm:$0xff] %vm255_vm0, %v763_v31  ;;  %v758_v33 = vadd.f32 %v884_v13, %v757_v32 }
 0x23c   : > { %v1015_v34 = vpop.f32.mrf.mxu1 }
 0x23d   : > { %796 = vst.msk [vmem:[%s1309_s9 + $0x50] sm:$0xff] %vm255_vm0, %v758_v33  ;;  %v773_v35 = vadd.f32 %v1015_v34, %v884_v13 }
 0x23e   : > { %v767_v36 = vpop.f32.mrf.mxu1 }
 0x23f   : > { %799 = vst.msk [vmem:[%s1309_s9 + $0x68] sm:$0xff] %vm255_vm0, %v773_v35  ;;  %v768_v37 = vadd.f32 %v884_v13, %v767_v36 }
 0x240   : > { %v997_v38 = vpop.f32.mrf.mxu0 }
 0x241   : > { %798 = vst.msk [vmem:[%s1309_s9 + $0x60] sm:$0xff] %vm255_vm0, %v768_v37  ;;  %v713_v39 = vadd.f32 %v997_v38, %v884_v13 }
 0x242   : > { %v707_v40 = vpop.f32.mrf.mxu0  ;;  %v1018_v41 = vpop.f32.mrf.mxu1 }
 0x243   : > { %787 = vst.msk [vmem:[%s1309_s9 + $0x8] sm:$0xff] %vm255_vm0, %v713_v39  ;;  %v708_v42 = vadd.f32 %v884_v13, %v707_v40  ;;  %v783_v43 = vadd.f32 %v1018_v41, %v884_v13 }
 0x244   : > { %v777_v44 = vpop.f32.mrf.mxu1 }
 0x245   : > { %786 = vst.msk [vmem:[%s1309_s9] sm:$0xff] %vm255_vm0, %v708_v42  ;;  %801 = vst.msk [vmem:[%s1309_s9 + $0x78] sm:$0xff] %vm255_vm0, %v783_v43  ;;  %v778_v45 = vadd.f32 %v884_v13, %v777_v44 }
 0x247   : > { %800 = vst.msk [vmem:[%s1309_s9 + $0x70] sm:$0xff] %vm255_vm0, %v778_v45 }
 0x248 PF: > { %s15_s18 = sadd.s32 1, %s1082_s18  }
 0x249   : > { %p12_p4 = scmp.ge.s32.totalorder %s15_s18, 4  }
 0x24b   :  { %14 = sbr.rel (!%p12_p4) target bundleno = 1 (0x1), region = 70 }

</bundles_post_ra>
